<compile_context>
chip_gen: v6e
topology: v6e:2x2x1
jax: 0.10.0
libtpu: 0.0.40
codegen_flags: <defaults>
</compile_context>

<pallas_src>
import functools

import jax
import jax.numpy as jnp
from jax.experimental import pallas as pl
from jax.experimental.pallas import tpu as pltpu


def _round_up(v, m):
    return ((v + m - 1) // m) * m


# ---------------------------------------------------------------------------
# Pallas kernels
# ---------------------------------------------------------------------------

def gnn_kernel(a_ref, xw_ref, b_ref, h_ref, acc_ref):
    """psi_1 second stage: H = relu(A @ XW + b), tiled over (rows, K)."""
    @pl.when(pl.program_id(1) == 0)
    def _():
        acc_ref[...] = jnp.zeros_like(acc_ref)

    acc_ref[...] += jnp.dot(a_ref[...], xw_ref[...],
                            preferred_element_type=jnp.float32)

    @pl.when(pl.program_id(1) == pl.num_programs(1) - 1)
    def _():
        h_ref[...] = jnp.maximum(acc_ref[...] + b_ref[...], 0.0).astype(h_ref.dtype)


def matcher_kernel(hs_ref, ht_ref, sm_ref, tm_ref,
                   w1_ref, b1_ref, w2_ref, b2_ref,
                   s0_ref, out_ref, *, inv_ns):
    """TB graphs per step: similarity, masked softmax, readout, 2-layer MLP."""
    hs = hs_ref[...]          # (TB, N_s, C)   bf16
    ht = ht_ref[...]          # (TB, N_t, C)   bf16
    sm = sm_ref[...]          # (TB, N_s, 1)   f32 {0,1}
    tm = tm_ref[...]          # (TB, 1,  N_t)  f32 {0,1}
    c = hs.shape[-1]

    # S_hat = h_s @ h_t^T  (batched contraction on last dims; no transpose temp).
    s_hat = jnp.einsum('bsc,btc->bst', hs, ht,
                       preferred_element_type=jnp.float32)           # (TB,Ns,Nt)

    # Masked softmax over the last dim (masked -> 0, fully-masked rows -> 0).
    mask = sm * tm                                                    # (TB,Ns,Nt)
    logits = jnp.where(mask > 0.0, s_hat, jnp.float32(-1e30))
    m = jnp.max(logits, axis=-1, keepdims=True)
    e = jnp.exp(logits - m) * mask
    denom = jnp.sum(e, axis=-1, keepdims=True)
    inv = jnp.where(denom > 0.0, pl.reciprocal(denom, approx=False), 0.0)
    s0 = e * inv
    s0_ref[...] = s0.astype(s0_ref.dtype)

    # r_s = S_0 @ h_t
    r_s = jnp.einsum('bst,btc->bsc', s0.astype(ht.dtype), ht,
                     preferred_element_type=jnp.float32)              # (TB,Ns,C)

    # h_st = cat(h_s, r_s, -1); mean over the dense node axis (length N_s).
    # cat + Linear(2C->C) == hm_s @ W1[:C] + hm_r @ W1[C:].
    hm_s = jnp.sum(hs.astype(jnp.float32), axis=1) * inv_ns           # (TB, C)
    hm_r = jnp.sum(r_s, axis=1) * inv_ns                              # (TB, C)

    z = jnp.dot(hm_s, w1_ref[0:c, :], preferred_element_type=jnp.float32)
    z += jnp.dot(hm_r, w1_ref[c:2 * c, :], preferred_element_type=jnp.float32)
    z = jnp.maximum(z + b1_ref[...], 0.0)
    out = jnp.dot(z, w2_ref[...], preferred_element_type=jnp.float32) + b2_ref[...]
    out_ref[...] = out.astype(out_ref.dtype)


# ---------------------------------------------------------------------------
# Wrappers
# ---------------------------------------------------------------------------

def psi_1_forward(x, edge_index, w, b, *, max_tile=512):
    """Synthetic GNN psi_1 (edge_attr ignored): relu(A @ (X @ W) + b)."""
    n = x.shape[0]
    c_out = w.shape[1]

    # Hoist XW = X @ W (tiny) and cast operands to bf16 (f32 accumulation).
    xw = (x.astype(jnp.float32) @ w).astype(jnp.bfloat16)

    tile = min(max_tile, _round_up(n, 128))
    n_pad = _round_up(n, tile)

    src, dst = edge_index[0], edge_index[1]
    adj = jnp.zeros((n_pad, n_pad), jnp.float32).at[dst, src].add(1.0)
    adj = adj + jnp.eye(n_pad, dtype=jnp.float32)          # self loops
    adj = adj.astype(jnp.bfloat16)                         # small ints -> exact
    xw_pad = jnp.zeros((n_pad, c_out), jnp.bfloat16).at[:n].set(xw)

    h = pl.pallas_call(
        gnn_kernel,
        grid=(n_pad // tile, n_pad // tile),
        in_specs=[
            pl.BlockSpec((tile, tile), lambda i, k: (i, k)),     # A tile
            pl.BlockSpec((tile, c_out), lambda i, k: (k, 0)),    # XW tile
            pl.BlockSpec((1, c_out), lambda i, k: (0, 0)),       # bias (resident)
        ],
        out_specs=pl.BlockSpec((tile, c_out), lambda i, k: (i, 0)),
        out_shape=jax.ShapeDtypeStruct((n_pad, c_out), jnp.float32),
        scratch_shapes=[pltpu.VMEM((tile, c_out), jnp.float32)],
        compiler_params=pltpu.CompilerParams(
            dimension_semantics=("parallel", "arbitrary"),
            vmem_limit_bytes=32 * 1024 * 1024),
    )(adj, xw_pad, b.reshape(1, -1))
    return h[:n]


def to_dense_batch(h, batch, num_graphs, max_nodes):
    """[N_total, C] + batch vector -> ([B, max_nodes, C], [B, max_nodes] mask)."""
    n = h.shape[0]
    counts = jax.ops.segment_sum(jnp.ones((n,), jnp.int32), batch,
                                 num_segments=num_graphs)
    starts = jnp.concatenate(
        [jnp.zeros((1,), jnp.int32), jnp.cumsum(counts)[:-1]])
    pos = jnp.arange(n, dtype=jnp.int32) - starts[batch]
    idx = batch * max_nodes + pos
    dense = jnp.zeros((num_graphs * max_nodes, h.shape[1]), h.dtype).at[idx].set(h)
    mask = jnp.zeros((num_graphs * max_nodes,), jnp.bool_).at[idx].set(True)
    return dense.reshape(num_graphs, max_nodes, -1), mask.reshape(num_graphs, max_nodes)


def graph_matcher_forward(params,
                          x_s, edge_index_s, edge_attr_s, batch_s,
                          x_t, edge_index_t, edge_attr_t, batch_t,
                          num_graphs, max_nodes_s, max_nodes_t):
    del edge_attr_s, edge_attr_t          # psi_1 ignores edge features here
    w_gnn, b_gnn, w1, b1, w2, b2 = params
    c = w_gnn.shape[1]
    g = w2.shape[1]

    # Lane/sublane-friendly padded sizes.
    g_pad = _round_up(g, 128)
    n_s_pad = _round_up(max_nodes_s, 8)
    n_t_pad = _round_up(max_nodes_t, 128)
    b = num_graphs
    if b <= 8:
        tb, b_pad = b, b                  # full-batch block (full-dim rule)
    else:
        tb, b_pad = 8, _round_up(b, 8)    # 8 graphs per grid step

    h_s = psi_1_forward(x_s, edge_index_s, w_gnn, b_gnn)
    h_t = psi_1_forward(x_t, edge_index_t, w_gnn, b_gnn)

    h_s_d, s_mask = to_dense_batch(h_s, batch_s, b, n_s_pad)
    h_t_d, t_mask = to_dense_batch(h_t, batch_t, b, n_t_pad)

    # bf16 operands, zero-padded batch dim.
    h_s_b = jnp.zeros((b_pad, n_s_pad, c), jnp.bfloat16).at[:b].set(
        h_s_d.astype(jnp.bfloat16))
    h_t_b = jnp.zeros((b_pad, n_t_pad, c), jnp.bfloat16).at[:b].set(
        h_t_d.astype(jnp.bfloat16))
    sm_f = jnp.zeros((b_pad, n_s_pad, 1), jnp.float32).at[:b].set(
        s_mask.astype(jnp.float32)[..., None])
    tm_f = jnp.zeros((b_pad, 1, n_t_pad), jnp.float32).at[:b].set(
        t_mask.astype(jnp.float32)[:, None, :])

    # Pad the output projection to a lane-dense width (extra cols are zero).
    w2_p = jnp.zeros((c, g_pad), jnp.float32).at[:, :g].set(w2)
    b2_p = jnp.zeros((1, g_pad), jnp.float32).at[:, :g].set(b2.reshape(1, -1))

    kernel = functools.partial(matcher_kernel, inv_ns=1.0 / float(max_nodes_s))

    s0, out = pl.pallas_call(
        kernel,
        grid=(b_pad // tb,),
        in_specs=[
            pl.BlockSpec((tb, n_s_pad, c), lambda i: (i, 0, 0)),
            pl.BlockSpec((tb, n_t_pad, c), lambda i: (i, 0, 0)),
            pl.BlockSpec((tb, n_s_pad, 1), lambda i: (i, 0, 0)),
            pl.BlockSpec((tb, 1, n_t_pad), lambda i: (i, 0, 0)),
            pl.BlockSpec((2 * c, c), lambda i: (0, 0)),      # W1 (resident)
            pl.BlockSpec((1, c), lambda i: (0, 0)),          # b1
            pl.BlockSpec((c, g_pad), lambda i: (0, 0)),      # W2 (resident)
            pl.BlockSpec((1, g_pad), lambda i: (0, 0)),      # b2
        ],
        out_specs=[
            pl.BlockSpec((tb, n_s_pad, n_t_pad), lambda i: (i, 0, 0)),
            pl.BlockSpec((tb, g_pad), lambda i: (i, 0)),
        ],
        out_shape=[
            jax.ShapeDtypeStruct((b_pad, n_s_pad, n_t_pad), jnp.float32),
            jax.ShapeDtypeStruct((b_pad, g_pad), jnp.float32),
        ],
        compiler_params=pltpu.CompilerParams(
            dimension_semantics=("parallel",),
            vmem_limit_bytes=32 * 1024 * 1024),
    )(h_s_b, h_t_b, sm_f, tm_f, w1, b1.reshape(1, -1), w2_p, b2_p)

    out = out[:b, :g]
    s0 = s0[:b, :max_nodes_s, :max_nodes_t]
    aux = (h_s_b[:b, :max_nodes_s].astype(jnp.float32),
           h_t_b[:b, :max_nodes_t].astype(jnp.float32),
           s_mask[:b, :max_nodes_s], t_mask[:b, :max_nodes_t])
    return out, s0, aux


# ---------------------------------------------------------------------------
# Pure-JAX reference for correctness check (matcher hot path)
# ---------------------------------------------------------------------------

def reference_matcher(h_s, h_t, s_mask, t_mask, w1, b1, w2, b2):
    s_hat = jnp.einsum('bsc,btc->bst', h_s, h_t)
    mask = s_mask[:, :, None] & t_mask[:, None, :]
    logits = jnp.where(mask, s_hat, -1e30)
    e = jnp.exp(logits - logits.max(-1, keepdims=True)) * mask
    denom = e.sum(-1, keepdims=True)
    s0 = jnp.where(denom > 0, e / denom, 0.0)
    r_s = jnp.einsum('bst,btc->bsc', s0, h_t)
    hm = jnp.concatenate([h_s.mean(1), r_s.mean(1)], axis=-1)
    z = jnp.maximum(hm @ w1 + b1, 0.0)
    return z @ w2 + b2, s0


# ---------------------------------------------------------------------------
# Example setup
# ---------------------------------------------------------------------------

def ring_edges(node_counts):
    src, dst = [], []
    offset = 0
    for n in node_counts:
        for i in range(n):
            j = (i + 1) % n
            src += [offset + i, offset + j]
            dst += [offset + j, offset + i]
        offset += n
    return jnp.array([src, dst], dtype=jnp.int32)


def make_batch_vec(node_counts):
    vec = []
    for gidx, n in enumerate(node_counts):
        vec += [gidx] * n
    return jnp.array(vec, dtype=jnp.int32)


if __name__ == "__main__":
    C_IN, C_OUT, GEMBD = 4, 32, 96          # gembd_vec_dim default = 96
    B = 2
    src_sizes = [8, 6]                      # source graphs: 8 and 6 nodes
    tgt_sizes = [7, 8]                      # target graphs: 7 and 8 nodes
    N_S, N_T = max(src_sizes), max(tgt_sizes)

    key = jax.random.PRNGKey(0)
    k = jax.random.split(key, 8)
    x_s = jax.random.normal(k[0], (sum(src_sizes), C_IN), jnp.float32)
    x_t = jax.random.normal(k[1], (sum(tgt_sizes), C_IN), jnp.float32)
    edge_index_s = ring_edges(src_sizes)
    edge_index_t = ring_edges(tgt_sizes)
    batch_s = make_batch_vec(src_sizes)
    batch_t = make_batch_vec(tgt_sizes)

    # Deterministic synthetic parameters (psi_1 + 2-layer MLP).
    w_gnn = jax.random.normal(k[2], (C_IN, C_OUT), jnp.float32) * 0.2
    b_gnn = jax.random.normal(k[3], (C_OUT,), jnp.float32) * 0.05
    w1 = jax.random.normal(k[4], (2 * C_OUT, C_OUT), jnp.float32) * 0.1
    b1 = jax.random.normal(k[5], (C_OUT,), jnp.float32) * 0.05
    w2 = jax.random.normal(k[6], (C_OUT, GEMBD), jnp.float32) * 0.1
    b2 = jax.random.normal(k[7], (GEMBD,), jnp.float32) * 0.05
    params = (w_gnn, b_gnn, w1, b1, w2, b2)

    fwd = jax.jit(functools.partial(graph_matcher_forward, params,
                                    num_graphs=B, max_nodes_s=N_S,
                                    max_nodes_t=N_T))
    out, s0, (h_s_d, h_t_d, s_mask, t_mask) = fwd(
        x_s, edge_index_s, None, batch_s,
        x_t, edge_index_t, None, batch_t)
    out = jax.block_until_ready(out)
    s0 = jax.block_until_ready(s0)

    # Correctness check against pure-JAX reference (same bf16-rounded h inputs).
    ref_out, ref_s0 = reference_matcher(h_s_d, h_t_d, s_mask, t_mask,
                                        w1, b1, w2, b2)
    assert out.shape == (B, GEMBD)
    assert s0.shape == (B, N_S, N_T)
    # out tolerance absorbs bf16 rounding of s0 / h on the MXU path.
    assert jnp.allclose(out, ref_out, atol=2e-2, rtol=2e-2)
    assert jnp.allclose(s0, ref_s0, atol=2e-4, rtol=2e-4)

    print("KERNEL_OK")
</pallas_src>

<mosaic_0001>
module attributes {stable_mosaic.version = 11 : i64} {
  func.func @gnn_kernel(%arg0: i32, %arg1: i32, %arg2: memref<128x128xbf16, #tpu.memory_space<vmem>>, %arg3: memref<128x32xbf16, #tpu.memory_space<vmem>>, %arg4: memref<1x32xf32, #tpu.memory_space<vmem>>, %arg5: memref<128x32xf32, #tpu.memory_space<vmem>>, %arg6: memref<128x32xf32, #tpu.memory_space<vmem>>) attributes {dimension_semantics = [#tpu.dimension_semantics<parallel>, #tpu.dimension_semantics<arbitrary>], iteration_bounds = array<i64: 1, 1>, scalar_prefetch = 0 : i64, scratch_operands = 1 : i64, tpu.core_type = #tpu.core_type<tc>, window_params = [{transform_indices = @transform_0, window_bounds = array<i64: 128, 128>}, {transform_indices = @transform_1, window_bounds = array<i64: 128, 32>}, {pipeline_mode = #tpu.pipeline_mode<synchronous>, transform_indices = @transform_2, window_bounds = array<i64: 1, 32>}, {transform_indices = @transform_3, window_bounds = array<i64: 128, 32>}]} {
    %c0_i32 = arith.constant 0 : i32
    %0 = arith.cmpi eq, %arg1, %c0_i32 : i32
    %1 = arith.extui %0 : i1 to i32
    %c0_i32_0 = arith.constant 0 : i32
    %2 = arith.cmpi ne, %1, %c0_i32_0 : i32
    scf.if %2 {
      %cst_10 = arith.constant 0.000000e+00 : f32
      %12 = vector.broadcast %cst_10 : f32 to vector<128x32xf32>
      %c0_11 = arith.constant 0 : index
      %c0_12 = arith.constant 0 : index
      %13 = vector.load %arg6[%c0_11, %c0_12] : memref<128x32xf32, #tpu.memory_space<vmem>>, vector<128x32xf32>
      tpu.vector_store %arg6[%c0_11, %c0_12], %12 {strides = array<i32>} : memref<128x32xf32, #tpu.memory_space<vmem>>, vector<128x32xf32>,
    } else {
    }
    %c0 = arith.constant 0 : index
    %c0_1 = arith.constant 0 : index
    %3 = vector.load %arg6[%c0, %c0_1] : memref<128x32xf32, #tpu.memory_space<vmem>>, vector<128x32xf32>
    %c0_2 = arith.constant 0 : index
    %c0_3 = arith.constant 0 : index
    %4 = vector.load %arg2[%c0_2, %c0_3] : memref<128x128xbf16, #tpu.memory_space<vmem>>, vector<128x128xbf16>
    %c0_4 = arith.constant 0 : index
    %c0_5 = arith.constant 0 : index
    %5 = vector.load %arg3[%c0_4, %c0_5] : memref<128x32xbf16, #tpu.memory_space<vmem>>, vector<128x32xbf16>
    %cst = arith.constant dense<0.000000e+00> : vector<128x32xf32>
    %6 = tpu.matmul %4, %5, %cst {dimension_numbers = #tpu.dot_dimension_numbers<[1], [0], [0], [1], [0, 0, 1, 1], [], []>} : vector<128x128xbf16>, vector<128x32xbf16>, vector<128x32xf32> -> vector<128x32xf32>
    %7 = arith.addf %3, %6 : vector<128x32xf32>
    %c0_6 = arith.constant 0 : index
    %c0_7 = arith.constant 0 : index
    %8 = vector.load %arg6[%c0_6, %c0_7] : memref<128x32xf32, #tpu.memory_space<vmem>>, vector<128x32xf32>
    tpu.vector_store %arg6[%c0_6, %c0_7], %7 {strides = array<i32>} : memref<128x32xf32, #tpu.memory_space<vmem>>, vector<128x32xf32>,
    %c0_i32_8 = arith.constant 0 : i32
    %9 = arith.cmpi eq, %arg1, %c0_i32_8 : i32
    %10 = arith.extui %9 : i1 to i32
    %c0_i32_9 = arith.constant 0 : i32
    %11 = arith.cmpi ne, %10, %c0_i32_9 : i32
    scf.if %11 {
      %c0_10 = arith.constant 0 : index
      %c0_11 = arith.constant 0 : index
      %12 = vector.load %arg6[%c0_10, %c0_11] : memref<128x32xf32, #tpu.memory_space<vmem>>, vector<128x32xf32>
      %c0_12 = arith.constant 0 : index
      %c0_13 = arith.constant 0 : index
      %13 = vector.load %arg4[%c0_12, %c0_13] : memref<1x32xf32, #tpu.memory_space<vmem>>, vector<1x32xf32>
      %14 = vector.broadcast %13 : vector<1x32xf32> to vector<128x32xf32>
      %15 = arith.addf %12, %14 : vector<128x32xf32>
      %cst_14 = arith.constant 0.000000e+00 : f32
      %16 = vector.broadcast %cst_14 : f32 to vector<128x32xf32>
      %17 = arith.maximumf %15, %16 : vector<128x32xf32>
      %c0_15 = arith.constant 0 : index
      %c0_16 = arith.constant 0 : index
      %18 = vector.load %arg5[%c0_15, %c0_16] : memref<128x32xf32, #tpu.memory_space<vmem>>, vector<128x32xf32>
      tpu.vector_store %arg5[%c0_15, %c0_16], %17 {strides = array<i32>} : memref<128x32xf32, #tpu.memory_space<vmem>>, vector<128x32xf32>,
    } else {
    }
    return
  }
  func.func @transform_0(%arg0: i32, %arg1: i32) -> (i32, i32) {
    %c0_i32 = arith.constant 0 : i32
    return %arg0, %arg1 : i32, i32
  }
  func.func @transform_1(%arg0: i32, %arg1: i32) -> (i32, i32) {
    %c0_i32 = arith.constant 0 : i32
    %c0_i32_0 = arith.constant 0 : i32
    return %arg1, %c0_i32 : i32, i32
  }
  func.func @transform_2(%arg0: i32, %arg1: i32) -> (i32, i32) {
    %c0_i32 = arith.constant 0 : i32
    %c0_i32_0 = arith.constant 0 : i32
    %c0_i32_1 = arith.constant 0 : i32
    return %c0_i32, %c0_i32_0 : i32, i32
  }
  func.func @transform_3(%arg0: i32, %arg1: i32) -> (i32, i32) {
    %c0_i32 = arith.constant 0 : i32
    %c0_i32_0 = arith.constant 0 : i32
    return %arg0, %c0_i32 : i32, i32
  }
}

module attributes {stable_mosaic.version = 11 : i64} {
  func.func @matcher_kernel(%arg0: i32, %arg1: memref<2x8x32xbf16, #tpu.memory_space<vmem>>, %arg2: memref<2x128x32xbf16, #tpu.memory_space<vmem>>, %arg3: memref<2x8x1xf32, #tpu.memory_space<vmem>>, %arg4: memref<2x1x128xf32, #tpu.memory_space<vmem>>, %arg5: memref<64x32xf32, #tpu.memory_space<vmem>>, %arg6: memref<1x32xf32, #tpu.memory_space<vmem>>, %arg7: memref<32x128xf32, #tpu.memory_space<vmem>>, %arg8: memref<1x128xf32, #tpu.memory_space<vmem>>, %arg9: memref<2x8x128xf32, #tpu.memory_space<vmem>>, %arg10: memref<2x128xf32, #tpu.memory_space<vmem>>) attributes {dimension_semantics = [#tpu.dimension_semantics<parallel>], iteration_bounds = array<i64: 1>, scalar_prefetch = 0 : i64, scratch_operands = 0 : i64, tpu.core_type = #tpu.core_type<tc>, window_params = [{transform_indices = @transform_0, window_bounds = array<i64: 2, 8, 32>}, {transform_indices = @transform_1, window_bounds = array<i64: 2, 128, 32>}, {transform_indices = @transform_2, window_bounds = array<i64: 2, 8, 1>}, {transform_indices = @transform_3, window_bounds = array<i64: 2, 1, 128>}, {pipeline_mode = #tpu.pipeline_mode<synchronous>, transform_indices = @transform_4, window_bounds = array<i64: 64, 32>}, {pipeline_mode = #tpu.pipeline_mode<synchronous>, transform_indices = @transform_5, window_bounds = array<i64: 1, 32>}, {pipeline_mode = #tpu.pipeline_mode<synchronous>, transform_indices = @transform_6, window_bounds = array<i64: 32, 128>}, {pipeline_mode = #tpu.pipeline_mode<synchronous>, transform_indices = @transform_7, window_bounds = array<i64: 1, 128>}, {transform_indices = @transform_8, window_bounds = array<i64: 2, 8, 128>}, {transform_indices = @transform_9, window_bounds = array<i64: 2, 128>}]} {
    %c0 = arith.constant 0 : index
    %c0_0 = arith.constant 0 : index
    %c0_1 = arith.constant 0 : index
    %0 = vector.load %arg1[%c0, %c0_0, %c0_1] : memref<2x8x32xbf16, #tpu.memory_space<vmem>>, vector<2x8x32xbf16>
    %c0_2 = arith.constant 0 : index
    %c0_3 = arith.constant 0 : index
    %c0_4 = arith.constant 0 : index
    %1 = vector.load %arg2[%c0_2, %c0_3, %c0_4] : memref<2x128x32xbf16, #tpu.memory_space<vmem>>, vector<2x128x32xbf16>
    %c0_5 = arith.constant 0 : index
    %c0_6 = arith.constant 0 : index
    %c0_7 = arith.constant 0 : index
    %2 = vector.load %arg3[%c0_5, %c0_6, %c0_7] : memref<2x8x1xf32, #tpu.memory_space<vmem>>, vector<2x8x1xf32>
    %c0_8 = arith.constant 0 : index
    %c0_9 = arith.constant 0 : index
    %c0_10 = arith.constant 0 : index
    %3 = vector.load %arg4[%c0_8, %c0_9, %c0_10] : memref<2x1x128xf32, #tpu.memory_space<vmem>>, vector<2x1x128xf32>
    "tpu.trace_start"() <{level = 10 : i32, message = "bsc,btc->bst"}> : () -> ()
    %cst = arith.constant dense<0.000000e+00> : vector<2x8x128xf32>
    %4 = tpu.matmul %0, %1, %cst {dimension_numbers = #tpu.dot_dimension_numbers<[2], [2], [1], [1], [0, 0, 0, 1, 1, 1], [0], [0]>} : vector<2x8x32xbf16>, vector<2x128x32xbf16>, vector<2x8x128xf32> -> vector<2x8x128xf32>
    "tpu.trace_stop"() : () -> ()
    %5 = vector.broadcast %2 : vector<2x8x1xf32> to vector<2x8x128xf32>
    %6 = vector.broadcast %3 : vector<2x1x128xf32> to vector<2x8x128xf32>
    %7 = arith.mulf %5, %6 : vector<2x8x128xf32>
    %cst_11 = arith.constant 0.000000e+00 : f32
    %8 = vector.broadcast %cst_11 : f32 to vector<2x8x128xf32>
    %9 = arith.cmpf ogt, %7, %8 : vector<2x8x128xf32>
    %cst_12 = arith.constant -1.000000e+30 : f32
    %10 = vector.broadcast %cst_12 : f32 to vector<2x8x128xf32>
    %11 = arith.select %9, %4, %10 : vector<2x8x128xi1>, vector<2x8x128xf32>
    %cst_13 = arith.constant dense<0xFF800000> : vector<2x8xf32>
    %12 = vector.multi_reduction <maximumf>, %11, %cst_13 [2] : vector<2x8x128xf32> to vector<2x8xf32>
    %13 = vector.shape_cast %12 : vector<2x8xf32> to vector<2x8x1xf32>
    %14 = vector.broadcast %13 : vector<2x8x1xf32> to vector<2x8x128xf32>
    %15 = arith.subf %11, %14 : vector<2x8x128xf32>
    %16 = math.exp %15 : vector<2x8x128xf32>
    %17 = arith.mulf %16, %7 : vector<2x8x128xf32>
    %cst_14 = arith.constant dense<0.000000e+00> : vector<2x8xf32>
    %18 = vector.multi_reduction <add>, %17, %cst_14 [2] : vector<2x8x128xf32> to vector<2x8xf32>
    %19 = vector.shape_cast %18 : vector<2x8xf32> to vector<2x8x1xf32>
    %cst_15 = arith.constant 0.000000e+00 : f32
    %20 = vector.broadcast %cst_15 : f32 to vector<2x8x1xf32>
    %21 = arith.cmpf ogt, %19, %20 : vector<2x8x1xf32>
    %22 = tpu.reciprocal %19 : vector<2x8x1xf32> -> vector<2x8x1xf32>
    %cst_16 = arith.constant 0.000000e+00 : f32
    %23 = vector.broadcast %cst_16 : f32 to vector<2x8x1xf32>
    %24 = arith.select %21, %22, %23 : vector<2x8x1xi1>, vector<2x8x1xf32>
    %25 = vector.broadcast %24 : vector<2x8x1xf32> to vector<2x8x128xf32>
    %26 = arith.mulf %17, %25 : vector<2x8x128xf32>
    %c0_17 = arith.constant 0 : index
    %c0_18 = arith.constant 0 : index
    %c0_19 = arith.constant 0 : index
    %27 = vector.load %arg9[%c0_17, %c0_18, %c0_19] : memref<2x8x128xf32, #tpu.memory_space<vmem>>, vector<2x8x128xf32>
    tpu.vector_store %arg9[%c0_17, %c0_18, %c0_19], %26 {strides = array<i32>} : memref<2x8x128xf32, #tpu.memory_space<vmem>>, vector<2x8x128xf32>,
    %28 = arith.truncf %26 : vector<2x8x128xf32> to vector<2x8x128xbf16>
    "tpu.trace_start"() <{level = 10 : i32, message = "bst,btc->bsc"}> : () -> ()
    %cst_20 = arith.constant dense<0.000000e+00> : vector<2x8x32xf32>
    %29 = tpu.matmul %28, %1, %cst_20 {dimension_numbers = #tpu.dot_dimension_numbers<[2], [1], [1], [2], [0, 0, 0, 1, 1, 2], [0], [0]>} : vector<2x8x128xbf16>, vector<2x128x32xbf16>, vector<2x8x32xf32> -> vector<2x8x32xf32>
    "tpu.trace_stop"() : () -> ()
    %30 = arith.extf %0 : vector<2x8x32xbf16> to vector<2x8x32xf32>
    %cst_21 = arith.constant dense<0.000000e+00> : vector<2x32xf32>
    %31 = vector.multi_reduction <add>, %30, %cst_21 [1] : vector<2x8x32xf32> to vector<2x32xf32>
    %cst_22 = arith.constant 1.250000e-01 : f32
    %32 = vector.broadcast %cst_22 : f32 to vector<2x32xf32>
    %33 = arith.mulf %31, %32 : vector<2x32xf32>
    %cst_23 = arith.constant dense<0.000000e+00> : vector<2x32xf32>
    %34 = vector.multi_reduction <add>, %29, %cst_23 [1] : vector<2x8x32xf32> to vector<2x32xf32>
    %cst_24 = arith.constant 1.250000e-01 : f32
    %35 = vector.broadcast %cst_24 : f32 to vector<2x32xf32>
    %36 = arith.mulf %34, %35 : vector<2x32xf32>
    %c0_25 = arith.constant 0 : index
    %c0_26 = arith.constant 0 : index
    %37 = vector.load %arg5[%c0_25, %c0_26] : memref<64x32xf32, #tpu.memory_space<vmem>>, vector<32x32xf32>
    %cst_27 = arith.constant dense<0.000000e+00> : vector<2x32xf32>
    %38 = tpu.matmul %33, %37, %cst_27 {dimension_numbers = #tpu.dot_dimension_numbers<[1], [0], [0], [1], [0, 0, 1, 1], [], []>} : vector<2x32xf32>, vector<32x32xf32>, vector<2x32xf32> -> vector<2x32xf32>
    %c32 = arith.constant 32 : index
    %c0_28 = arith.constant 0 : index
    %39 = vector.load %arg5[%c32, %c0_28] : memref<64x32xf32, #tpu.memory_space<vmem>>, vector<32x32xf32>
    %cst_29 = arith.constant dense<0.000000e+00> : vector<2x32xf32>
    %40 = tpu.matmul %36, %39, %cst_29 {dimension_numbers = #tpu.dot_dimension_numbers<[1], [0], [0], [1], [0, 0, 1, 1], [], []>} : vector<2x32xf32>, vector<32x32xf32>, vector<2x32xf32> -> vector<2x32xf32>
    %41 = arith.addf %38, %40 : vector<2x32xf32>
    %c0_30 = arith.constant 0 : index
    %c0_31 = arith.constant 0 : index
    %42 = vector.load %arg6[%c0_30, %c0_31] : memref<1x32xf32, #tpu.memory_space<vmem>>, vector<1x32xf32>
    %43 = vector.broadcast %42 : vector<1x32xf32> to vector<2x32xf32>
    %44 = arith.addf %41, %43 : vector<2x32xf32>
    %cst_32 = arith.constant 0.000000e+00 : f32
    %45 = vector.broadcast %cst_32 : f32 to vector<2x32xf32>
    %46 = arith.maximumf %44, %45 : vector<2x32xf32>
    %c0_33 = arith.constant 0 : index
    %c0_34 = arith.constant 0 : index
    %47 = vector.load %arg7[%c0_33, %c0_34] : memref<32x128xf32, #tpu.memory_space<vmem>>, vector<32x128xf32>
    %cst_35 = arith.constant dense<0.000000e+00> : vector<2x128xf32>
    %48 = tpu.matmul %46, %47, %cst_35 {dimension_numbers = #tpu.dot_dimension_numbers<[1], [0], [0], [1], [0, 0, 1, 1], [], []>} : vector<2x32xf32>, vector<32x128xf32>, vector<2x128xf32> -> vector<2x128xf32>
    %c0_36 = arith.constant 0 : index
    %c0_37 = arith.constant 0 : index
    %49 = vector.load %arg8[%c0_36, %c0_37] : memref<1x128xf32, #tpu.memory_space<vmem>>, vector<1x128xf32>
    %50 = vector.broadcast %49 : vector<1x128xf32> to vector<2x128xf32>
    %51 = arith.addf %48, %50 : vector<2x128xf32>
    %c0_38 = arith.constant 0 : index
    %c0_39 = arith.constant 0 : index
    %52 = vector.load %arg10[%c0_38, %c0_39] : memref<2x128xf32, #tpu.memory_space<vmem>>, vector<2x128xf32>
    tpu.vector_store %arg10[%c0_38, %c0_39], %51 {strides = array<i32>} : memref<2x128xf32, #tpu.memory_space<vmem>>, vector<2x128xf32>,
    return
  }
  func.func @transform_0(%arg0: i32) -> (i32, i32, i32) {
    %c0_i32 = arith.constant 0 : i32
    %c0_i32_0 = arith.constant 0 : i32
    %c0_i32_1 = arith.constant 0 : i32
    return %arg0, %c0_i32, %c0_i32_0 : i32, i32, i32
  }
  func.func @transform_1(%arg0: i32) -> (i32, i32, i32) {
    %c0_i32 = arith.constant 0 : i32
    %c0_i32_0 = arith.constant 0 : i32
    %c0_i32_1 = arith.constant 0 : i32
    return %arg0, %c0_i32, %c0_i32_0 : i32, i32, i32
  }
  func.func @transform_2(%arg0: i32) -> (i32, i32, i32) {
    %c0_i32 = arith.constant 0 : i32
    %c0_i32_0 = arith.constant 0 : i32
    %c0_i32_1 = arith.constant 0 : i32
    return %arg0, %c0_i32, %c0_i32_0 : i32, i32, i32
  }
  func.func @transform_3(%arg0: i32) -> (i32, i32, i32) {
    %c0_i32 = arith.constant 0 : i32
    %c0_i32_0 = arith.constant 0 : i32
    %c0_i32_1 = arith.constant 0 : i32
    return %arg0, %c0_i32, %c0_i32_0 : i32, i32, i32
  }
  func.func @transform_4(%arg0: i32) -> (i32, i32) {
    %c0_i32 = arith.constant 0 : i32
    %c0_i32_0 = arith.constant 0 : i32
    %c0_i32_1 = arith.constant 0 : i32
    return %c0_i32, %c0_i32_0 : i32, i32
  }
  func.func @transform_5(%arg0: i32) -> (i32, i32) {
    %c0_i32 = arith.constant 0 : i32
    %c0_i32_0 = arith.constant 0 : i32
    %c0_i32_1 = arith.constant 0 : i32
    return %c0_i32, %c0_i32_0 : i32, i32
  }
  func.func @transform_6(%arg0: i32) -> (i32, i32) {
    %c0_i32 = arith.constant 0 : i32
    %c0_i32_0 = arith.constant 0 : i32
    %c0_i32_1 = arith.constant 0 : i32
    return %c0_i32, %c0_i32_0 : i32, i32
  }
  func.func @transform_7(%arg0: i32) -> (i32, i32) {
    %c0_i32 = arith.constant 0 : i32
    %c0_i32_0 = arith.constant 0 : i32
    %c0_i32_1 = arith.constant 0 : i32
    return %c0_i32, %c0_i32_0 : i32, i32
  }
  func.func @transform_8(%arg0: i32) -> (i32, i32, i32) {
    %c0_i32 = arith.constant 0 : i32
    %c0_i32_0 = arith.constant 0 : i32
    %c0_i32_1 = arith.constant 0 : i32
    return %arg0, %c0_i32, %c0_i32_0 : i32, i32, i32
  }
  func.func @transform_9(%arg0: i32) -> (i32, i32) {
    %c0_i32 = arith.constant 0 : i32
    %c0_i32_0 = arith.constant 0 : i32
    return %arg0, %c0_i32 : i32, i32
  }
}

</mosaic_0001>

<bundles_post_ra>
// kernel: graph_matcher_forward.3
= control target key start
LH: loop header
LB: loop body
LE: loop exit
PB: predicated region body
PF: predicated region fallthrough
CT: control target
= control target key end

     0   :  { %vm19_vm0 = vcmask 261120   ;;  %v486_v1 = vmov 0.0   ;;  %s672_s1 = inlined_call_operand.vmem [shape: bf16[128,32], index: 1, kind: input, shape index: {}]   ;;  %s673_s0 = inlined_call_operand.vmem [shape: bf16[128,128], index: 0, kind: input, shape index: {}]   ;;  %s674_s2 = inlined_call_operand.vmem [shape: f32[1,32], index: 2, kind: input, shape index: {}]   ;;  %s675_s3 = inlined_call_operand.vmem [shape: f32[128,32], index: 3, kind: output, shape index: {}]  }
   0x1   :  { %v470_v0 = vld [vmem:[%s672_s1 + $0x38] sm:$0xff]   ;;  %22 = vst.msk [vmem:[#allocation2 + $0x10] sm:$0xff] %vm19_vm0, %v486_v1  ;;  %20 = vst.msk [vmem:[#allocation2] sm:$0xff] %vm19_vm0, %v486_v1  ;;  %v471_v2 = vld [vmem:[%s672_s1 + $0x30] sm:$0xff]  }
   0x2   :  { %21 = vst.msk [vmem:[#allocation2 + $0x8] sm:$0xff] %vm19_vm0, %v486_v1  ;;  %23 = vst.msk [vmem:[#allocation2 + $0x18] sm:$0xff] %vm19_vm0, %v486_v1  ;;  %421 = vmatprep.subr.bf16.mxu0 %v470_v0  ;;  %453 = vmatprep.subr.bf16.mxu1 %v470_v0  ;;  %v472_v3 = vld [vmem:[%s672_s1 + $0x28] sm:$0xff]   ;;  %v473_v4 = vld [vmem:[%s672_s1 + $0x20] sm:$0xff]  }
   0x3   :  { %24 = vst.msk [vmem:[#allocation2 + $0x20] sm:$0xff] %vm19_vm0, %v486_v1  ;;  %25 = vst.msk [vmem:[#allocation2 + $0x28] sm:$0xff] %vm19_vm0, %v486_v1  ;;  %422 = vmatpush3.bf16.msra.mxu0 %v470_v0  ;;  %461 = vmatpush3.bf16.msra.mxu1 %v470_v0  ;;  %v478_v5 = vld [vmem:[%s673_s0] sm:$0xff]   ;;  %v474_v7 = vld [vmem:[%s672_s1 + $0x18] sm:$0xff]  }
   0x4   :  { %26 = vst.msk [vmem:[#allocation2 + $0x30] sm:$0xff] %vm19_vm0, %v486_v1  ;;  %27 = vst.msk [vmem:[#allocation2 + $0x38] sm:$0xff] %vm19_vm0, %v486_v1  ;;  %423 = vmatprep.subr.bf16.mxu0 %v471_v2  ;;  %454 = vmatprep.subr.bf16.mxu1 %v471_v2  ;;  %v479_v6 = vld [vmem:[%s673_s0 + $0x20] sm:$0xff]   ;;  %v475_v8 = vld [vmem:[%s672_s1 + $0x10] sm:$0xff]  }
   0x5   :  { %28 = vst.msk [vmem:[#allocation2 + $0x40] sm:$0xff] %vm19_vm0, %v486_v1  ;;  %29 = vst.msk [vmem:[#allocation2 + $0x48] sm:$0xff] %vm19_vm0, %v486_v1  ;;  %437 = vmatprep.mubr.bf16.mxu0 %v478_v5  ;;  %445 = vmatprep.mubr.bf16.mxu1 %v479_v6  ;;  %v476_v9 = vld [vmem:[%s672_s1 + $0x8] sm:$0xff]   ;;  %v477_v10 = vld [vmem:[%s672_s1] sm:$0xff]  }
   0x6   :  { %30 = vst.msk [vmem:[#allocation2 + $0x50] sm:$0xff] %vm19_vm0, %v486_v1  ;;  %31 = vst.msk [vmem:[#allocation2 + $0x58] sm:$0xff] %vm19_vm0, %v486_v1  ;;  %v480_v11 = vld [vmem:[%s673_s0 + $0x8] sm:$0xff]   ;;  %v482_v13 = vld [vmem:[%s673_s0 + $0x10] sm:$0xff]  }
   0x7   :  { %32 = vst.msk [vmem:[#allocation2 + $0x60] sm:$0xff] %vm19_vm0, %v486_v1  ;;  %33 = vst.msk [vmem:[#allocation2 + $0x68] sm:$0xff] %vm19_vm0, %v486_v1  ;;  %424 = vmatpush3.bf16.msra.mxu0 %v471_v2  ;;  %462 = vmatpush3.bf16.msra.mxu1 %v471_v2  ;;  %v481_v12 = vld [vmem:[%s673_s0 + $0x28] sm:$0xff]   ;;  %v483_v14 = vld [vmem:[%s673_s0 + $0x30] sm:$0xff]  }
   0x8   :  { %34 = vst.msk [vmem:[#allocation2 + $0x70] sm:$0xff] %vm19_vm0, %v486_v1  ;;  %35 = vst.msk [vmem:[#allocation2 + $0x78] sm:$0xff] %vm19_vm0, %v486_v1  ;;  %425 = vmatprep.subr.bf16.mxu0 %v472_v3  ;;  %455 = vmatprep.subr.bf16.mxu1 %v472_v3  ;;  %v484_v15 = vld [vmem:[%s673_s0 + $0x18] sm:$0xff]   ;;  %v38_v17 = vld [vmem:[#allocation2 + $0x10] sm:$0xff] }
   0x9   :  { %v485_v16 = vld [vmem:[%s673_s0 + $0x38] sm:$0xff]   ;;  %v36_v21 = vld [vmem:[#allocation2] sm:$0xff]  ;;  %v37_v33 = vld [vmem:[#allocation2 + $0x8] sm:$0xff] }
   0xa   :  { %v39_v27 = vld [vmem:[#allocation2 + $0x18] sm:$0xff]  ;;  %v580_v43 = vld [vmem:[%s674_s2] ss:$0 sm:$0xff] }
   0xb   :  { %426 = vmatpush3.bf16.msra.mxu0 %v472_v3  ;;  %463 = vmatpush3.bf16.msra.mxu1 %v472_v3  ;;  %v42_v39 = vld [vmem:[#allocation2 + $0x30] sm:$0xff]  ;;  %v40_v46 = vld [vmem:[#allocation2 + $0x20] sm:$0xff]  ;;  %v43_v58 = vld [vmem:[#allocation2 + $0x38] sm:$0xff] }
   0xc   :  { %427 = vmatprep.subr.bf16.mxu0 %v473_v4  ;;  %456 = vmatprep.subr.bf16.mxu1 %v473_v4  ;;  %v44_v22 = vld [vmem:[#allocation2 + $0x40] sm:$0xff]  ;;  %v45_v34 = vld [vmem:[#allocation2 + $0x48] sm:$0xff] }
   0xd   :  { %v46_v18 = vld [vmem:[#allocation2 + $0x50] sm:$0xff]  ;;  %v47_v28 = vld [vmem:[#allocation2 + $0x58] sm:$0xff] }
   0xe   :  { %v48_v47 = vld [vmem:[#allocation2 + $0x60] sm:$0xff]  ;;  %v49_v5 = vld [vmem:[#allocation2 + $0x68] sm:$0xff] }
   0xf   :  { %428 = vmatpush3.bf16.msra.mxu0 %v473_v4  ;;  %464 = vmatpush3.bf16.msra.mxu1 %v473_v4  ;;  %v50_v40 = vld [vmem:[#allocation2 + $0x70] sm:$0xff]  ;;  %v51_v59 = vld [vmem:[#allocation2 + $0x78] sm:$0xff]  ;;  %v41_v4 = vld [vmem:[#allocation2 + $0x28] sm:$0xff] }
  0x10   :  { %429 = vmatprep.subr.bf16.mxu0 %v474_v7  ;;  %457 = vmatprep.subr.bf16.mxu1 %v474_v7 }
  0x13   :  { %430 = vmatpush3.bf16.msra.mxu0 %v474_v7  ;;  %465 = vmatpush3.bf16.msra.mxu1 %v474_v7 }
  0x14   :  { %431 = vmatprep.subr.bf16.mxu0 %v475_v8  ;;  %458 = vmatprep.subr.bf16.mxu1 %v475_v8 }
  0x17   :  { %432 = vmatpush3.bf16.msra.mxu0 %v475_v8  ;;  %466 = vmatpush3.bf16.msra.mxu1 %v475_v8 }
  0x18   :  { %433 = vmatprep.subr.bf16.mxu0 %v476_v9  ;;  %459 = vmatprep.subr.bf16.mxu1 %v476_v9 }
  0x1b   :  { %434 = vmatpush3.bf16.msra.mxu0 %v476_v9  ;;  %467 = vmatpush3.bf16.msra.mxu1 %v476_v9 }
  0x1c   :  { %435 = vmatprep.subr.bf16.mxu0 %v477_v10  ;;  %460 = vmatprep.subr.bf16.mxu1 %v477_v10 }
  0x1f   :  { %436 = vmatpush3.bf16.msra.mxu0 %v477_v10  ;;  %468 = vmatpush3.bf16.msra.mxu1 %v477_v10 }
  0x22   :  { %438 = vmatmul.mubr.bf16.vlgmr.msra.gmra.mxu0 %v480_v11  ;;  %446 = vmatmul.mubr.bf16.vlgmr.msra.gmra.mxu1 %v481_v12 }
  0x23   :  { %441 = vmatprep.mubr.bf16.mxu0 %v482_v13  ;;  %449 = vmatprep.mubr.bf16.mxu1 %v483_v14 }
  0x2a   :  { %442 = vmatmul.mubr.bf16.gmra.mxu0 %v484_v15  ;;  %450 = vmatmul.mubr.bf16.gmra.mxu1 %v485_v16 }
  0xe2   :  { %v439_v19 = vpop.f32.mrf.mxu0  ;;  %v447_v20 = vpop.f32.mrf.mxu1 }
  0xe3   :  { %v279_v23 = vadd.f32 %v439_v19, %v38_v17  ;;  %v287_v24 = vadd.f32 %v447_v20, %v46_v18 }
  0xe4   :  { %v214_v25 = vpop.f32.mrf.mxu0  ;;  %v246_v26 = vpop.f32.mrf.mxu1 }
  0xe5   :  { %296 = vst.msk [vmem:[#allocation2 + $0x10] sm:$0xff] %vm19_vm0, %v279_v23  ;;  %304 = vst.msk [vmem:[#allocation2 + $0x50] sm:$0xff] %vm19_vm0, %v287_v24  ;;  %v277_v29 = vadd.f32 %v214_v25, %v36_v21  ;;  %v285_v30 = vadd.f32 %v246_v26, %v44_v22 }
  0xe6   :  { %v440_v31 = vpop.f32.mrf.mxu0  ;;  %v448_v32 = vpop.f32.mrf.mxu1 }
  0xe7   :  { %294 = vst.msk [vmem:[#allocation2] sm:$0xff] %vm19_vm0, %v277_v29  ;;  %302 = vst.msk [vmem:[#allocation2 + $0x40] sm:$0xff] %vm19_vm0, %v285_v30  ;;  %v280_v35 = vadd.f32 %v440_v31, %v39_v27  ;;  %v288_v36 = vadd.f32 %v448_v32, %v47_v28 }
  0xe8   :  { %v217_v37 = vpop.f32.mrf.mxu0  ;;  %v249_v38 = vpop.f32.mrf.mxu1 }
  0xe9   :  { %297 = vst.msk [vmem:[#allocation2 + $0x18] sm:$0xff] %vm19_vm0, %v280_v35  ;;  %305 = vst.msk [vmem:[#allocation2 + $0x58] sm:$0xff] %vm19_vm0, %v288_v36  ;;  %v278_v41 = vadd.f32 %v217_v37, %v37_v33  ;;  %v286_v42 = vadd.f32 %v249_v38, %v45_v34 }
  0xea   :  { %v443_v44 = vpop.f32.mrf.mxu0  ;;  %v451_v45 = vpop.f32.mrf.mxu1 }
  0xeb   :  { %295 = vst.msk [vmem:[#allocation2 + $0x8] sm:$0xff] %vm19_vm0, %v278_v41  ;;  %303 = vst.msk [vmem:[#allocation2 + $0x48] sm:$0xff] %vm19_vm0, %v286_v42  ;;  %v283_v48 = vadd.f32 %v443_v44, %v42_v39  ;;  %v291_v49 = vadd.f32 %v451_v45, %v50_v40 }
  0xec   :  { %v315_v50 = vld [vmem:[#allocation2 + $0x10] sm:$0xff]  ;;  %v230_v52 = vpop.f32.mrf.mxu0  ;;  %v262_v53 = vpop.f32.mrf.mxu1 }
  0xed   :  { %v323_v51 = vld [vmem:[#allocation2 + $0x50] sm:$0xff]  ;;  %v338_v54 = vadd.f32 %v580_v43, %v315_v50  ;;  %300 = vst.msk [vmem:[#allocation2 + $0x30] sm:$0xff] %vm19_vm0, %v283_v48  ;;  %308 = vst.msk [vmem:[#allocation2 + $0x70] sm:$0xff] %vm19_vm0, %v291_v49  ;;  %v281_v56 = vadd.f32 %v230_v52, %v40_v46  ;;  %v289_v57 = vadd.f32 %v262_v53, %v48_v47 }
  0xee   :  { %v346_v55 = vadd.f32 %v580_v43, %v323_v51  ;;  %v313_v60 = vld [vmem:[#allocation2] sm:$0xff]  ;;  %v444_v62 = vpop.f32.mrf.mxu0  ;;  %v452_v63 = vpop.f32.mrf.mxu1 }
  0xef   :  { %v321_v61 = vld [vmem:[#allocation2 + $0x40] sm:$0xff]  ;;  %v354_v0 = vmax.f32 %v338_v54, 0.0  ;;  %v336_v2 = vadd.f32 %v580_v43, %v313_v60  ;;  %298 = vst.msk [vmem:[#allocation2 + $0x20] sm:$0xff] %vm19_vm0, %v281_v56  ;;  %306 = vst.msk [vmem:[#allocation2 + $0x60] sm:$0xff] %vm19_vm0, %v289_v57  ;;  %v284_v8 = vadd.f32 %v444_v62, %v43_v58  ;;  %v292_v9 = vadd.f32 %v452_v63, %v51_v59 }
  0xf0   :  { %v362_v1 = vmax.f32 %v346_v55, 0.0  ;;  %v344_v3 = vadd.f32 %v580_v43, %v321_v61  ;;  %v316_v6 = vld [vmem:[#allocation2 + $0x18] sm:$0xff]  ;;  %v233_v10 = vpop.f32.mrf.mxu0  ;;  %v265_v11 = vpop.f32.mrf.mxu1 }
  0xf1   :  { %v324_v7 = vld [vmem:[#allocation2 + $0x58] sm:$0xff]  ;;  %370 = vst.msk [vmem:[%s675_s3 + $0x10] sm:$0xff] %vm19_vm0, %v354_v0  ;;  %v352_v12 = vmax.f32 %v336_v2, 0.0  ;;  %v339_v14 = vadd.f32 %v580_v43, %v316_v6  ;;  %301 = vst.msk [vmem:[#allocation2 + $0x38] sm:$0xff] %vm19_vm0, %v284_v8  ;;  %v282_v18 = vadd.f32 %v233_v10, %v41_v4  ;;  %v290_v19 = vadd.f32 %v265_v11, %v49_v5 }
  0xf2   :  { %378 = vst.msk [vmem:[%s675_s3 + $0x50] sm:$0xff] %vm19_vm0, %v362_v1  ;;  %v360_v13 = vmax.f32 %v344_v3, 0.0  ;;  %v347_v15 = vadd.f32 %v580_v43, %v324_v7  ;;  %v314_v16 = vld [vmem:[#allocation2 + $0x8] sm:$0xff]  ;;  %309 = vst.msk [vmem:[#allocation2 + $0x78] sm:$0xff] %vm19_vm0, %v292_v9 }
  0xf3   :  { %v322_v17 = vld [vmem:[#allocation2 + $0x48] sm:$0xff]  ;;  %368 = vst.msk [vmem:[%s675_s3] sm:$0xff] %vm19_vm0, %v352_v12  ;;  %v355_v20 = vmax.f32 %v339_v14, 0.0  ;;  %v337_v22 = vadd.f32 %v580_v43, %v314_v16  ;;  %299 = vst.msk [vmem:[#allocation2 + $0x28] sm:$0xff] %vm19_vm0, %v282_v18 }
  0xf4   :  { %376 = vst.msk [vmem:[%s675_s3 + $0x40] sm:$0xff] %vm19_vm0, %v360_v13  ;;  %v363_v21 = vmax.f32 %v347_v15, 0.0  ;;  %v345_v23 = vadd.f32 %v580_v43, %v322_v17  ;;  %v319_v24 = vld [vmem:[#allocation2 + $0x30] sm:$0xff]  ;;  %307 = vst.msk [vmem:[#allocation2 + $0x68] sm:$0xff] %vm19_vm0, %v290_v19 }
  0xf5   :  { %v327_v25 = vld [vmem:[#allocation2 + $0x70] sm:$0xff]  ;;  %371 = vst.msk [vmem:[%s675_s3 + $0x18] sm:$0xff] %vm19_vm0, %v355_v20  ;;  %v353_v26 = vmax.f32 %v337_v22, 0.0  ;;  %v342_v28 = vadd.f32 %v580_v43, %v319_v24 }
  0xf6   :  { %379 = vst.msk [vmem:[%s675_s3 + $0x58] sm:$0xff] %vm19_vm0, %v363_v21  ;;  %v361_v27 = vmax.f32 %v345_v23, 0.0  ;;  %v350_v29 = vadd.f32 %v580_v43, %v327_v25  ;;  %v317_v30 = vld [vmem:[#allocation2 + $0x20] sm:$0xff] }
  0xf7   :  { %v325_v31 = vld [vmem:[#allocation2 + $0x60] sm:$0xff]  ;;  %369 = vst.msk [vmem:[%s675_s3 + $0x8] sm:$0xff] %vm19_vm0, %v353_v26  ;;  %v358_v32 = vmax.f32 %v342_v28, 0.0  ;;  %v340_v34 = vadd.f32 %v580_v43, %v317_v30 }
  0xf8   :  { %377 = vst.msk [vmem:[%s675_s3 + $0x48] sm:$0xff] %vm19_vm0, %v361_v27  ;;  %v366_v33 = vmax.f32 %v350_v29, 0.0  ;;  %v348_v35 = vadd.f32 %v580_v43, %v325_v31  ;;  %v320_v38 = vld [vmem:[#allocation2 + $0x38] sm:$0xff] }
  0xf9   :  { %374 = vst.msk [vmem:[%s675_s3 + $0x30] sm:$0xff] %vm19_vm0, %v358_v32  ;;  %v356_v36 = vmax.f32 %v340_v34, 0.0  ;;  %v328_v39 = vld [vmem:[#allocation2 + $0x78] sm:$0xff]  ;;  %v343_v40 = vadd.f32 %v580_v43, %v320_v38 }
  0xfa   :  { %382 = vst.msk [vmem:[%s675_s3 + $0x70] sm:$0xff] %vm19_vm0, %v366_v33  ;;  %v364_v37 = vmax.f32 %v348_v35, 0.0  ;;  %v351_v41 = vadd.f32 %v580_v43, %v328_v39  ;;  %v318_v42 = vld [vmem:[#allocation2 + $0x28] sm:$0xff] }
  0xfb   :  { %372 = vst.msk [vmem:[%s675_s3 + $0x20] sm:$0xff] %vm19_vm0, %v356_v36  ;;  %v326_v44 = vld [vmem:[#allocation2 + $0x68] sm:$0xff]  ;;  %v359_v45 = vmax.f32 %v343_v40, 0.0  ;;  %v341_v47 = vadd.f32 %v580_v43, %v318_v42 }
  0xfc   :  { %380 = vst.msk [vmem:[%s675_s3 + $0x60] sm:$0xff] %vm19_vm0, %v364_v37  ;;  %v367_v46 = vmax.f32 %v351_v41, 0.0  ;;  %v349_v48 = vadd.f32 %v580_v43, %v326_v44 }
  0xfd   :  { %375 = vst.msk [vmem:[%s675_s3 + $0x38] sm:$0xff] %vm19_vm0, %v359_v45  ;;  %v357_v49 = vmax.f32 %v341_v47, 0.0 }
  0xfe   :  { %383 = vst.msk [vmem:[%s675_s3 + $0x78] sm:$0xff] %vm19_vm0, %v367_v46  ;;  %v365_v50 = vmax.f32 %v349_v48, 0.0 }
  0xff   :  { %373 = vst.msk [vmem:[%s675_s3 + $0x28] sm:$0xff] %vm19_vm0, %v357_v49 }
 0x100   :  { %381 = vst.msk [vmem:[%s675_s3 + $0x68] sm:$0xff] %vm19_vm0, %v365_v50 }

// kernel: graph_matcher_forward.5
= control target key start
LH: loop header
LB: loop body
LE: loop exit
PB: predicated region body
PF: predicated region fallthrough
CT: control target
= control target key end

     0   :  { %15 = vsyncpa [#allocation3], 0  ;;  %v1021_v1 = vmov 0.0   ;;  %vm112_vm0 = vcmask 261120   ;;  %vm1022_vm1 = vmmov 0   ;;  %v1023_v14 = vmov 0   ;;  %s1309_s0 = inlined_call_operand.vmem [shape: bf16[2,8,32], index: 0, kind: input, shape index: {}]   ;;  %s1310_s1 = inlined_call_operand.vmem [shape: bf16[2,128,32], index: 1, kind: input, shape index: {}]   ;;  %s1311_s2 = inlined_call_operand.vmem [shape: f32[2,8,1], index: 2, kind: input, shape index: {}]   ;;  %s1312_s3 = inlined_call_operand.vmem [shape: f32[2,1,128], index: 3, kind: input, shape index: {}]   ;;  %s1313_s4 = inlined_call_operand.vmem [shape: f32[64,32], index: 4, kind: input, shape index: {}]   ;;  %s1314_s5 = inlined_call_operand.vmem [shape: f32[1,32], index: 5, kind: input, shape index: {}]   ;;  %s1315_s6 = inlined_call_operand.vmem [shape: f32[32,128], index: 6, kind: input, shape index: {}]   ;;  %s1316_s7 = inlined_call_operand.vmem [shape: f32[1,128], index: 7, kind: input, shape index: {}]   ;;  %s1317_s8 = inlined_call_operand.hbm [shape: f32[2,8,128], index: 8, kind: output, shape index: {0}]   ;;  %s1318_s9 = inlined_call_operand.hbm [shape: f32[2,128], index: 9, kind: output, shape index: {1}]  }
   0x1   :  { %v1081_v0 = vld [vmem:[%s1310_s1 + $0x38] sm:$0xff]   ;;  %832 = vmatprep.subr.bf16.mxu0 %v1021_v1  ;;  %852 = vmatprep.subr.bf16.mxu1 %v1021_v1  ;;  %v1098_v5 = vld [vmem:[%s1310_s1 + $0x30] sm:$0xff]   ;;  %v1114_v9 = vld [vmem:[%s1310_s1 + $0x28] sm:$0xff]  }
   0x2   :  { %v1088_v2 = vld [vmem:[%s1310_s1 + $0x78] sm:$0xff]   ;;  %v138_v3 = vsel %vm112_vm0, %v1081_v0, 0  ;;  %v1104_v6 = vld [vmem:[%s1310_s1 + $0x70] sm:$0xff]   ;;  %v135_v7 = vsel %vm112_vm0, %v1098_v5, 0  ;;  %v1120_v10 = vld [vmem:[%s1310_s1 + $0x68] sm:$0xff]   ;;  %v132_v11 = vsel %vm112_vm0, %v1114_v9, 0  ;;  %848 = vmatprep.mubr.msk.bf16.mxu0 %vm1022_vm1, %v1021_v1  ;;  %868 = vmatprep.mubr.msk.bf16.mxu1 %vm1022_vm1, %v1021_v1 }
   0x3   :  { %833 = vmatpush3.bf16.xpose.msra.mxu0 %v138_v3  ;;  %v245_v4 = vsel %vm112_vm0, %v1088_v2, 0  ;;  %v242_v8 = vsel %vm112_vm0, %v1104_v6, 0  ;;  %v239_v12 = vsel %vm112_vm0, %v1120_v10, 0  ;;  %v68_v13 = vld [vmem:[%s1311_s2] sm:$0xff]  ;;  %952 = vset.pattern.permute.xlu0 %v1023_v14 }
   0x4   :  { %853 = vmatpush3.bf16.xpose.msra.mxu1 %v245_v4  ;;  %834 = vmatprep.subr.bf16.mxu0 %v1021_v1 }
   0x5   :  { %854 = vmatprep.subr.bf16.mxu1 %v1021_v1 }
   0xb   :  { %835 = vmatpush3.bf16.xpose.msra.mxu0 %v135_v7 }
   0xc   :  { %855 = vmatpush3.bf16.xpose.msra.mxu1 %v242_v8  ;;  %836 = vmatprep.subr.bf16.mxu0 %v1021_v1 }
   0xd   :  { %856 = vmatprep.subr.bf16.mxu1 %v1021_v1 }
   0xe   :  { %16 = vsyncpa [#allocation5], 0  ;;  %289 = vperm.xlu0 %952, %v68_v13   ;;  %v959_v15 = vld [vmem:[%s1310_s1 + $0x20] sm:$0xff]   ;;  %v69_v16 = vld [vmem:[%s1311_s2 + $0x8] sm:$0xff]  ;;  %vm483_vm6 = vcmask 1041409  }
   0xf   :  { %v960_v17 = vld [vmem:[%s1310_s1 + $0x60] sm:$0xff]   ;;  %v129_v18 = vsel %vm112_vm0, %v959_v15, 0  ;;  %v961_v20 = vld [vmem:[%s1310_s1 + $0x18] sm:$0xff]   ;;  %v963_v24 = vld [vmem:[%s1310_s1 + $0x10] sm:$0xff]  }
  0x10   :  { %v236_v19 = vsel %vm112_vm0, %v960_v17, 0  ;;  %v962_v21 = vld [vmem:[%s1310_s1 + $0x58] sm:$0xff]   ;;  %v126_v22 = vsel %vm112_vm0, %v961_v20, 0  ;;  %v964_v25 = vld [vmem:[%s1310_s1 + $0x50] sm:$0xff]   ;;  %v123_v26 = vsel %vm112_vm0, %v963_v24, 0  ;;  %v965_v28 = vld [vmem:[%s1310_s1 + $0x8] sm:$0xff]  }
  0x11   :  { %v233_v23 = vsel %vm112_vm0, %v962_v21, 0  ;;  %v230_v27 = vsel %vm112_vm0, %v964_v25, 0  ;;  %v966_v29 = vld [vmem:[%s1310_s1 + $0x48] sm:$0xff]   ;;  %v120_v30 = vsel %vm112_vm0, %v965_v28, 0  ;;  %v967_v32 = vld [vmem:[%s1310_s1] sm:$0xff]  }
  0x12   :  { %294 = vperm.xlu0 %952, %v69_v16   ;;  %v227_v31 = vsel %vm112_vm0, %v966_v29, 0  ;;  %v968_v33 = vld [vmem:[%s1310_s1 + $0x40] sm:$0xff]   ;;  %v117_v34 = vsel %vm112_vm0, %v967_v32, 0 }
  0x13   :  { %837 = vmatpush3.bf16.xpose.msra.mxu0 %v132_v11  ;;  %v224_v35 = vsel %vm112_vm0, %v968_v33, 0  ;;  %v1191_v36 = vld [vmem:[%s1309_s0] sm:$0xf]  ;;  %v1196_v37 = vld [vmem:[%s1309_s0 + $0x4] sm:$0xf] }
  0x14   :  { %857 = vmatpush3.bf16.xpose.msra.mxu1 %v239_v12  ;;  %838 = vmatprep.subr.bf16.mxu0 %v1021_v1  ;;  %v774_v39 = vld [vmem:[%s1312_s3] ss:$0 sm:$0xff]  ;;  %v775_v41 = vld [vmem:[%s1312_s3 + $0x1] ss:$0 sm:$0xff]  ;;  %v439_v11 = vunpack.c.l.bf16 %v1191_v36  ;;  %v440_v12 = vunpack.c.l.bf16 %v1196_v37  ;;  %s1024_s3 = smov [#allocation2]  }
  0x15   :  { %858 = vmatprep.subr.bf16.mxu1 %v1021_v1  ;;  %s731_s29 = sshll.u32 %s1024_s3, 4  ;;  %s732_s29 = int_to_ptr.vmem [resolvable:$true] %s731_s29 }
  0x16   :  { %v441_v13 = vsel %vm112_vm0, %v439_v11, 0.0  ;;  %v448_v14 = vsel %vm112_vm0, %v440_v12, 0.0  ;;  %s977_s30 = scalar_lea.vmem %s732_s29, 256  ;;  %p982_p1 = scmp.lt.s32.totalorder %s732_s29, %s732_s29 }
  0x17   :  { %v449_v16 = vrot.slane %v448_v14, 4  ;;  %p978_p0 = scmp.ne.s32.totalorder %s732_s29, %s977_s30  ;;  %p983_p2 = scmp.lt.s32.totalorder %s977_s30, %s977_s30 }
  0x19   :  { %p984_p3 = por %p983_p2, %p982_p1 }
  0x1b   :  { %839 = vmatpush3.bf16.xpose.msra.mxu0 %v129_v18  ;;  %v450_v18 = vadd.f32 %v449_v16, %v448_v14  ;;  %p985_p4 = pnand %p984_p3, %p978_p0 }
  0x1c   :  { %859 = vmatpush3.bf16.xpose.msra.mxu1 %v236_v19  ;;  %840 = vmatprep.subr.bf16.mxu0 %v1021_v1 }
  0x1d   :  { %860 = vmatprep.subr.bf16.mxu1 %v1021_v1 }
  0x23   :  { %841 = vmatpush3.bf16.xpose.msra.mxu0 %v126_v22 }
  0x24   :  { %861 = vmatpush3.bf16.xpose.msra.mxu1 %v233_v23  ;;  %842 = vmatprep.subr.bf16.mxu0 %v1021_v1 }
  0x25   :  { %862 = vmatprep.subr.bf16.mxu1 %v1021_v1 }
  0x2b   :  { %843 = vmatpush3.bf16.xpose.msra.mxu0 %v123_v26  ;;  %v480_v26 = vld [vmem:[%s1313_s4 + $0x38] sm:$0xff] }
  0x2c   :  { %863 = vmatpush3.bf16.xpose.msra.mxu1 %v230_v27  ;;  %844 = vmatprep.subr.bf16.mxu0 %v1021_v1  ;;  %v475_v27 = vld [vmem:[%s1313_s4 + $0x10] sm:$0xff] }
  0x2d   :  { %864 = vmatprep.subr.bf16.mxu1 %v1021_v1 }
  0x33   :  { %845 = vmatpush3.bf16.xpose.msra.mxu0 %v120_v30  ;;  %v479_v30 = vld [vmem:[%s1313_s4 + $0x30] sm:$0xff] }
  0x34   :  { %865 = vmatpush3.bf16.xpose.msra.mxu1 %v227_v31  ;;  %846 = vmatprep.subr.bf16.mxu0 %v1021_v1  ;;  %v474_v31 = vld [vmem:[%s1313_s4 + $0x8] sm:$0xff] }
  0x35   :  { %866 = vmatprep.subr.bf16.mxu1 %v1021_v1 }
  0x3b   :  { %847 = vmatpush3.bf16.xpose.msra.mxu0 %v117_v34  ;;  %v478_v34 = vld [vmem:[%s1313_s4 + $0x28] sm:$0xff] }
  0x3c   :  { %867 = vmatpush3.bf16.xpose.msra.mxu1 %v224_v35  ;;  %872 = vmatprep.subr.bf16.mxu0 %v1021_v1  ;;  %v473_v35 = vld [vmem:[%s1313_s4] sm:$0xff] }
  0x3d   :  { %892 = vmatprep.subr.bf16.mxu1 %v1021_v1 }
  0x42   :  { %849 = vmatmul.mubr.msk.bf16.vlgmr.msra.gmra.mxu0 %vm112_vm0, %v1191_v36  ;;  %v477_v36 = vld [vmem:[%s1313_s4 + $0x20] sm:$0xff] }
  0x43   :  { %869 = vmatmul.mubr.msk.bf16.vlgmr.msra.gmra.mxu1 %vm112_vm0, %v1196_v37  ;;  %873 = vmatpush3.bf16.msra.mxu0 %v1081_v0 }
  0x44   :  { %874 = vmatprep.subr.bf16.mxu0 %v1021_v1  ;;  %893 = vmatpush3.bf16.msra.mxu1 %v1088_v2 }
  0x45   :  { %894 = vmatprep.subr.bf16.mxu1 %v1021_v1  ;;  %888 = vmatprep.mubr.msk.bf16.mxu0 %vm1022_vm1, %v1021_v1 }
  0x46   :  { %908 = vmatprep.mubr.msk.bf16.mxu1 %vm1022_vm1, %v1021_v1 }
  0x47   :  { %875 = vmatpush3.bf16.msra.mxu0 %v1098_v5 }
  0x48   :  { %876 = vmatprep.subr.bf16.mxu0 %v1021_v1  ;;  %895 = vmatpush3.bf16.msra.mxu1 %v1104_v6 }
  0x49   :  { %896 = vmatprep.subr.bf16.mxu1 %v1021_v1 }
  0x4b   :  { %877 = vmatpush3.bf16.msra.mxu0 %v1114_v9 }
  0x4c   :  { %878 = vmatprep.subr.bf16.mxu0 %v1021_v1  ;;  %897 = vmatpush3.bf16.msra.mxu1 %v1120_v10 }
  0x4d   :  { %898 = vmatprep.subr.bf16.mxu1 %v1021_v1 }
  0x4f   :  { %879 = vmatpush3.bf16.msra.mxu0 %v959_v15  ;;  %v442_v15 = vrot.slane %v441_v13, 4 }
  0x50   :  { %880 = vmatprep.subr.bf16.mxu0 %v1021_v1  ;;  %899 = vmatpush3.bf16.msra.mxu1 %v960_v17 }
  0x51   :  { %900 = vmatprep.subr.bf16.mxu1 %v1021_v1  ;;  %v443_v17 = vadd.f32 %v442_v15, %v441_v13 }
  0x53   :  { %881 = vmatpush3.bf16.msra.mxu0 %v961_v20  ;;  %v444_v19 = vrot.slane %v443_v17, 2  ;;  %v451_v20 = vrot.slane %v450_v18, 2 }
  0x54   :  { %882 = vmatprep.subr.bf16.mxu0 %v1021_v1  ;;  %901 = vmatpush3.bf16.msra.mxu1 %v962_v21 }
  0x55   :  { %902 = vmatprep.subr.bf16.mxu1 %v1021_v1  ;;  %v445_v21 = vadd.f32 %v444_v19, %v443_v17  ;;  %v452_v22 = vadd.f32 %v451_v20, %v450_v18 }
  0x57   :  { %883 = vmatpush3.bf16.msra.mxu0 %v963_v24  ;;  %v446_v23 = vrot.slane %v445_v21, 1  ;;  %v453_v24 = vrot.slane %v452_v22, 1 }
  0x58   :  { %884 = vmatprep.subr.bf16.mxu0 %v1021_v1  ;;  %903 = vmatpush3.bf16.msra.mxu1 %v964_v25  ;;  %v476_v25 = vld [vmem:[%s1313_s4 + $0x18] sm:$0xff] }
  0x59   :  { %904 = vmatprep.subr.bf16.mxu1 %v1021_v1 }
  0x5b   :  { %885 = vmatpush3.bf16.msra.mxu0 %v965_v28  ;;  %v447_v28 = vadd.f32 %v446_v23, %v445_v21 }
  0x5c   :  { %886 = vmatprep.subr.bf16.mxu0 %v1021_v1  ;;  %905 = vmatpush3.bf16.msra.mxu1 %v966_v29  ;;  %v454_v29 = vadd.f32 %v453_v24, %v452_v22 }
  0x5d   :  { %906 = vmatprep.subr.bf16.mxu1 %v1021_v1 }
  0x5f   :  { %887 = vmatpush3.bf16.msra.mxu0 %v967_v32  ;;  %v455_v32 = vmul.f32 0.125, %v447_v28 }
  0x60   :  { %907 = vmatpush3.bf16.msra.mxu1 %v968_v33  ;;  %912 = vmatprep.subr.mxu0 %v1021_v1  ;;  %v456_v33 = vmul.f32 0.125, %v454_v29 }
  0x61   :  { %923 = vmatprep.subr.mxu1 %v1021_v1 }
  0x62   :  { %v559_v37 = vsel %vm483_vm6, %v456_v33, %v455_v32 }
  0x89   :  { %v290_v38 = vpop.permute.xlu0 %289 }
  0x8a   :  { %v309_v40 = vmul.f32 %v774_v39, %v290_v38 }
  0x8c   :  { %vm311_vm2 = vcmp.gt.f32.partialorder %v309_v40, 0.0 }
  0x8d   :  { %v295_v42 = vpop.permute.xlu0 %294 }
  0x8e   :  { %v310_v43 = vmul.f32 %v775_v41, %v295_v42 }
  0x90   :  { %vm312_vm3 = vcmp.gt.f32.partialorder %v310_v43, 0.0 }
 0x102   :  { %v174_v44 = vpop.f32.mrf.mxu0 }
 0x103   :  { %v281_v45 = vpop.f32.mrf.mxu1  ;;  %v313_v46 = vsel %vm311_vm2, %v174_v44, -1e+30 }
 0x104   :  { %315 = vmax.xlane.f32.xlu1 %v313_v46  ;;  %v850_v47 = vpop.f32.mrf.mxu0  ;;  %v314_v51 = vsel %vm312_vm3, %v281_v45, -1e+30 }
 0x105   :  { %v870_v48 = vpop.f32.mrf.mxu1 }
 0x106   :  { %v177_v49 = vpop.f32.mrf.mxu0 }
 0x107   :  { %v284_v50 = vpop.f32.mrf.mxu1 }
 0x108   :  { %317 = vmax.xlane.f32.xlu1 %v314_v51  ;;  %v851_v52 = vpop.f32.mrf.mxu0 }
 0x109   :  { %v871_v53 = vpop.f32.mrf.mxu1 }
 0x18d   :  { %v316_v54 = vpop.xlane.xlu1 %315 }
 0x18e   :  { %v319_v55 = vsub.f32 %v313_v46, %v316_v54 }
 0x190   :  { %v321_v56 = vmul.f32 1.442695, %v319_v55 }
 0x191   :  { %v318_v57 = vpop.xlane.xlu1 %317 }
 0x192   :  { %969 = vpow2.f32 %v321_v56  ;;  %v320_v58 = vsub.f32 %v314_v51, %v318_v57 }
 0x194   :  { %v323_v59 = vmul.f32 1.442695, %v320_v58 }
 0x196   :  { %971 = vpow2.f32 %v323_v59 }
 0x19f   :  { %v970_v60 = vpop.eup %969 }
 0x1a0   :  { %v325_v61 = vmul.f32 %v970_v60, %v309_v40 }
 0x1a2   :  { %327 = vadd.xlane.f32.xlu0 %v325_v61 }
 0x1a3   :  { %v972_v62 = vpop.eup %971 }
 0x1a4   :  { %v326_v63 = vmul.f32 %v972_v62, %v310_v43 }
 0x1a6   :  { %329 = vadd.xlane.f32.xlu1 %v326_v63 }
 0x22b   :  { %v328_v0 = vpop.xlane.xlu0 %327 }
 0x22c   :  { %973 = vrcp.f32 %v328_v0  ;;  %vm331_vm4 = vcmp.gt.f32.partialorder %v328_v0, 0.0  ;;  %v644_v0 = vld [vmem:[%s1315_s6 + $0x18] sm:$0xff] }
 0x22f   :  { %v330_v2 = vpop.xlane.xlu1 %329 }
 0x230   :  { %975 = vrcp.f32 %v330_v2  ;;  %vm332_vm5 = vcmp.gt.f32.partialorder %v330_v2, 0.0 }
 0x239   :  { %v974_v3 = vpop.eup %973 }
 0x23a   :  { %v335_v4 = vsel %vm331_vm4, %v974_v3, 0.0  ;;  %v643_v3 = vld [vmem:[%s1315_s6 + $0x10] sm:$0xff] }
 0x23b   :  { %v337_v5 = vmul.f32 %v335_v4, %v325_v61  ;;  %v642_v4 = vld [vmem:[%s1315_s6 + $0x8] sm:$0xff] }
 0x23d   :  { %v976_v6 = vpop.eup %975  ;;  %339 = vst [vmem:[#allocation2] sm:$0xff] %v337_v5  ;;  %v341_v7 = vpack.c.bf16 %v337_v5, %v337_v5  ;;  %v641_v5 = vld [vmem:[%s1315_s6] sm:$0xff] }
 0x23e   :  { %v336_v8 = vsel %vm332_vm5, %v976_v6, 0.0 }
 0x23f   :  { %v338_v9 = vmul.f32 %v336_v8, %v326_v63  ;;  %889 = vmatmul.mubr.bf16.vlgmr.msra.gmra.mxu0 %v341_v7  ;;  %v778_v7 = vld [vmem:[%s1314_s5] ss:$0 sm:$0xff] }
 0x240   :  { %920 = vmatprep.mubr.msk.f32.mxu0 %vm1022_vm1, %v1021_v1  ;;  %913 = vmatpush3.msra.mxu0 %v480_v26 }
 0x241   :  { %340 = vst [vmem:[#allocation2 + $0x8] sm:$0xff] %v338_v9  ;;  %v342_v10 = vpack.c.bf16 %v338_v9, %v338_v9  ;;  %914 = vmatprep.subr.mxu0 %v1021_v1 }
 0x242   :  { %915 = vmatpush3.msra.mxu0 %v479_v30 }
 0x243   :  { %909 = vmatmul.mubr.bf16.vlgmr.msra.gmra.mxu1 %v342_v10  ;;  %916 = vmatprep.subr.mxu0 %v1021_v1 }
 0x244   :  { %931 = vmatprep.mubr.msk.f32.mxu1 %vm1022_vm1, %v1021_v1  ;;  %924 = vmatpush3.msra.mxu1 %v476_v25 }
 0x245   :  { %925 = vmatprep.subr.mxu1 %v1021_v1  ;;  %917 = vmatpush3.msra.mxu0 %v478_v34 }
 0x246   :  { %926 = vmatpush3.msra.mxu1 %v475_v27  ;;  %918 = vmatprep.subr.mxu0 %v1021_v1 }
 0x247   :  { %927 = vmatprep.subr.mxu1 %v1021_v1  ;;  %919 = vmatpush3.msra.mxu0 %v477_v36 }
 0x248   :  { %928 = vmatpush3.msra.mxu1 %v474_v31  ;;  %934 = vmatprep.subr.mxu0 %v1021_v1 }
 0x249   :  { %929 = vmatprep.subr.mxu1 %v1021_v1 }
 0x24a   :  { %930 = vmatpush3.msra.mxu1 %v473_v35 }
 0x24b   :  { %932 = vmatmul.mubr.msk.f32.vlgmr.msra.gmra.mxu1 %vm112_vm0, %v559_v37 }
 0x2ff   :  { %v385_v38 = vpop.f32.mrf.mxu0 }
 0x300   :  { %v457_v39 = vsel %vm112_vm0, %v385_v38, 0.0 }
 0x301   :  { %v458_v40 = vrot.slane %v457_v39, 4  ;;  %v890_v41 = vpop.f32.mrf.mxu0 }
 0x303   :  { %v459_v42 = vadd.f32 %v458_v40, %v457_v39  ;;  %v388_v43 = vpop.f32.mrf.mxu0  ;;  %v433_v44 = vpop.f32.mrf.mxu1 }
 0x304   :  { %v464_v45 = vsel %vm112_vm0, %v433_v44, 0.0 }
 0x305   :  { %v460_v46 = vrot.slane %v459_v42, 2  ;;  %v465_v47 = vrot.slane %v464_v45, 4  ;;  %v891_v48 = vpop.f32.mrf.mxu0  ;;  %v910_v49 = vpop.f32.mrf.mxu1 }
 0x307   :  { %v461_v50 = vadd.f32 %v460_v46, %v459_v42  ;;  %v466_v51 = vadd.f32 %v465_v47, %v464_v45  ;;  %v436_v52 = vpop.f32.mrf.mxu1 }
 0x309   :  { %v462_v53 = vrot.slane %v461_v50, 1  ;;  %v467_v54 = vrot.slane %v466_v51, 2  ;;  %v911_v55 = vpop.f32.mrf.mxu1 }
 0x30b   :  { %v468_v56 = vadd.f32 %v467_v54, %v466_v51  ;;  %v463_v57 = vadd.f32 %v462_v53, %v461_v50  ;;  %v628_v63 = vpop.f32.mrf.mxu1 }
 0x30d   :  { %v469_v58 = vrot.slane %v468_v56, 1  ;;  %v471_v60 = vmul.f32 0.125, %v463_v57  ;;  %v933_v2 = vpop.f32.mrf.mxu1 }
 0x30f   :  { %v470_v59 = vadd.f32 %v469_v58, %v468_v56 }
 0x311   :  { %v472_v61 = vmul.f32 0.125, %v470_v59 }
 0x313   :  { %v484_v62 = vsel %vm483_vm6, %v472_v61, %v471_v60 }
 0x314   :  { %921 = vmatmul.mubr.msk.f32.vlgmr.msra.gmra.mxu0 %vm112_vm0, %v484_v62 }
 0x315   :  { %942 = vmatprep.mubr.msk.f32.mxu0 %vm1022_vm1, %v1021_v1  ;;  %935 = vmatpush3.msra.mxu0 %v644_v0 }
 0x316   :  { %936 = vmatprep.subr.mxu0 %v1021_v1 }
 0x317   :  { %937 = vmatpush3.msra.mxu0 %v643_v3 }
 0x318   :  { %938 = vmatprep.subr.mxu0 %v1021_v1 }
 0x319   :  { %939 = vmatpush3.msra.mxu0 %v642_v4 }
 0x31a   :  { %940 = vmatprep.subr.mxu0 %v1021_v1 }
 0x31b   :  { %941 = vmatpush3.msra.mxu0 %v641_v5 }
 0x3d4   :  { %v553_v6 = vpop.f32.mrf.mxu0 }
 0x3d5   :  { %v629_v8 = vadd.f32 %v628_v63, %v553_v6 }
 0x3d6   :  { %v922_v9 = vpop.f32.mrf.mxu0 }
 0x3d7   :  { %v639_v10 = vadd.f32 %v778_v7, %v629_v8 }
 0x3d9   :  { %v640_v11 = vmax.f32 %v639_v10, 0.0 }
 0x3db   :  { %943 = vmatmul.mubr.msk.f32.vlgmr.msra.gmra.mxu0 %vm112_vm0, %v640_v11 }
 0x3dc   :  { %988 = shalt.err (!%p985_p4)
}
 0x3dd   :  { %s1025_s6 = smov 128   ;;  %s1026_s2 = smov 8   ;;  %v779_v1 = vld [vmem:[%s1316_s7] ss:$0 sm:$0xff] }
 0x3de   :  { %737 = dma.vmem_to_hbm [thread:$0]  %s732_s29, 256, %s1317_s8, [#allocation3], %s1025_s6, %s1025_s6, %s1026_s2  }
 0x3df   :  { %s1027_s13 = smov [#allocation4]  }
 0x3e0   :  { %s744_s14 = sshll.u32 %s1027_s13, 4  ;;  %s745_s14 = int_to_ptr.vmem [resolvable:$true] %s744_s14 }
 0x3e1   :  { %s997_s15 = scalar_lea.vmem %s745_s14, 32  ;;  %p1002_p6 = scmp.lt.s32.totalorder %s745_s14, %s745_s14 }
 0x3e2   :  { %p998_p5 = scmp.ne.s32.totalorder %s745_s14, %s997_s15  ;;  %p1003_p7 = scmp.lt.s32.totalorder %s997_s15, %s997_s15 }
 0x3e4   :  { %p1004_p8 = por %p1003_p7, %p1002_p6 }
 0x3e6   :  { %p1005_p9 = pnand %p1004_p8, %p998_p5 }
 0x49b   :  { %v721_v12 = vpop.f32.mrf.mxu0 }
 0x49c   :  { %v722_v13 = vadd.f32 %v779_v1, %v721_v12 }
 0x49d   :  { %v944_v14 = vpop.f32.mrf.mxu0 }
 0x49e   :  { %725 = vst [vmem:[#allocation4] sm:$0x3] %v722_v13 }
 0x49f   :  { %1008 = shalt.err (!%p1005_p9)
}
 0x4a0   :  { %747 = dma.vmem_to_hbm [thread:$0]  %s745_s14, 32, %s1318_s9, [#allocation5]  }
 0x4a1   :  { %1017 = dma.done.wait [#allocation3], 256  }
 0x4a2   :  { %1018 = vsyncadd [#allocation3], 4294967040 }
 0x4a3   :  { %1019 = dma.done.wait [#allocation5], 32  }
 0x4a4   :  { %1020 = vsyncadd [#allocation5], 4294967264 }
 0x4a5   :  { %754 = vsyncpa [#allocation3], 1 }
 0x4a6   :  { %755 = vsyncpa [#allocation5], 1 }

</bundles_post_ra>
